<compile_context>
chip_gen: v5e
topology: v5e:2x2
jax: 0.10.0
libtpu: 0.0.40
codegen_flags: <defaults>
</compile_context>

<pallas_src>
import functools

import jax
import jax.numpy as jnp
from jax.experimental import pallas as pl
from jax.experimental.pallas import tpu as pltpu

# ----------------------------- config (small, synthetic) -----------------------------
BATCH = 2
SEQ = 8
HIDDEN = 32
INTERMEDIATE = 64
NUM_EXPERTS = 4
TOP_K = 2
NUM_SHARED_EXPERT = 1
INIT_RANGE = 0.02

# Token tile.  Keep T // TOKEN_TILE >= 2 so the "parallel" token axis can span both
# v7x TensorCores.  TODO(synk): at production sizes use TT >= 128 (v5e) / 256
# (v6e, v7x), bounded by per-generation VMEM.
TOKEN_TILE = 8


# ----------------------------- fused Pallas kernel -----------------------------
def _fused_moe_kernel(x_ref, gu_ref, dw_ref, w_ref,
                      sgu_ref, sgub_ref, sdw_ref, sdb_ref,
                      o_ref, *, inter_total, inter_shared):
    """One grid step = one token tile; all experts + the shared expert fused.

    x_ref   : (TT, H)       bf16   token tile
    gu_ref  : (H, 2*E*I)    bf16   stacked [gate_0..gate_{E-1} | up_0..up_{E-1}]
    dw_ref  : (E*I, H)      bf16   stacked down-proj (rows expert-major)
    w_ref   : (TT, E*I)     f32    per-token combine weight, repeated I-wide per expert
    sgu_ref : (H, 2*Is)     bf16   shared expert [gate | up]
    sgub_ref: (1, 2*Is)     f32    shared expert [gate | up] bias
    sdw_ref : (Is, H)       bf16   shared expert down-proj
    sdb_ref : (1, H)        f32    shared expert down-proj bias
    o_ref   : (TT, H)              output tile (activation dtype)
    """
    x = x_ref[...]                                                       # (TT, H) bf16

    # ---- shared-expert SwiGLU MLP (bias=True) ----
    gu_s = jnp.dot(x, sgu_ref[...],
                   preferred_element_type=jnp.float32) + sgub_ref[...]   # (TT, 2Is) f32
    hs = (jax.nn.silu(gu_s[:, :inter_shared])
          * gu_s[:, inter_shared:]).astype(jnp.bfloat16)                 # (TT, Is) bf16
    acc = (jnp.dot(hs, sdw_ref[...],
                   preferred_element_type=jnp.float32) + sdb_ref[...])   # (TT, H) f32

    # ---- all routed experts in two stacked MXU passes ----
    gu_all = jnp.dot(x, gu_ref[...],
                     preferred_element_type=jnp.float32)                 # (TT, 2*E*I) f32
    h = jax.nn.silu(gu_all[:, :inter_total]) * gu_all[:, inter_total:]   # (TT, E*I) f32
    h = (h * w_ref[...]).astype(jnp.bfloat16)                            # fold combine weights
    acc = acc + jnp.dot(h, dw_ref[...],
                        preferred_element_type=jnp.float32)              # (TT, H) f32

    o_ref[...] = acc.astype(o_ref.dtype)


def fused_sparse_mlp(x_tok, dense_w_exp, gu_all, dw_all,
                     s_gu_w, s_gu_b, s_down_w, s_down_b, *, out_dtype):
    T, H = x_tok.shape
    EI2 = gu_all.shape[1]          # 2 * E * I
    EI = dw_all.shape[0]           # E * I
    Is2 = s_gu_w.shape[1]          # 2 * Is
    Is = s_down_w.shape[0]
    TT = min(T, TOKEN_TILE)
    assert T % TT == 0

    kernel = functools.partial(_fused_moe_kernel,
                               inter_total=EI2 // 2, inter_shared=Is2 // 2)
    return pl.pallas_call(
        kernel,
        out_shape=jax.ShapeDtypeStruct((T, H), out_dtype),
        grid=(T // TT,),
        in_specs=[
            pl.BlockSpec((TT, H), lambda t: (t, 0)),      # x tile
            pl.BlockSpec((H, EI2), lambda t: (0, 0)),     # stacked expert [gate|up] (fetched once)
            pl.BlockSpec((EI, H), lambda t: (0, 0)),      # stacked expert down-proj
            pl.BlockSpec((TT, EI), lambda t: (t, 0)),     # expanded combine weights
            pl.BlockSpec((H, Is2), lambda t: (0, 0)),     # shared [gate|up]
            pl.BlockSpec((1, Is2), lambda t: (0, 0)),     # shared [gate|up] bias
            pl.BlockSpec((Is, H), lambda t: (0, 0)),      # shared down
            pl.BlockSpec((1, H), lambda t: (0, 0)),       # shared down bias
        ],
        out_specs=pl.BlockSpec((TT, H), lambda t: (t, 0)),
        compiler_params=pltpu.CompilerParams(
            dimension_semantics=("parallel",)),
    )(x_tok, gu_all, dw_all, dense_w_exp, s_gu_w, s_gu_b, s_down_w, s_down_b)


# ----------------------------- weight preparation (one-time, XLA side) -----------------------------
def prepare_params(p):
    """Stack all experts' weights into single matmul operands, cast operands to bf16."""
    E, H, I = NUM_EXPERTS, HIDDEN, INTERMEDIATE
    gates = p["gate_w"].transpose(1, 0, 2).reshape(H, E * I)      # cols expert-major
    ups = p["up_w"].transpose(1, 0, 2).reshape(H, E * I)
    gu_all = jnp.concatenate([gates, ups], axis=1)                # (H, 2*E*I)
    dw_all = p["down_w"].reshape(E * I, H)                        # (E*I, H), rows expert-major
    sgu = jnp.concatenate([p["s_gate_w"], p["s_up_w"]], axis=-1)  # (H, 2Is)
    sgub = jnp.concatenate([p["s_gate_b"], p["s_up_b"]], axis=-1)  # (1, 2Is)
    return {
        "router_w_t": p["router_w_t"].astype(jnp.float32),
        "gu_all": gu_all.astype(jnp.bfloat16),
        "dw_all": dw_all.astype(jnp.bfloat16),
        "s_gu_w": sgu.astype(jnp.bfloat16),
        "s_gu_b": sgub.astype(jnp.float32),
        "s_down_w": p["s_down_w"].astype(jnp.bfloat16),
        "s_down_b": p["s_down_b"].astype(jnp.float32),
    }


# ----------------------------- full _SparseMLP forward -----------------------------
def sparse_mlp_forward(hidden_states, prepared):
    B, S, H = hidden_states.shape
    T = B * S
    x_tok = hidden_states.reshape(T, H).astype(jnp.float32)

    # Router (TopNRouter): tiny (T x E) matmul + top-k -- plain XLA beats a pallas launch.
    logits = x_tok @ prepared["router_w_t"]                       # (T, E)
    scores, top_idx = jax.lax.top_k(logits, TOP_K)                # (T, K)
    combine = jax.nn.softmax(scores, axis=-1)                     # (T, K)
    # Dense (T, E) combine map via compare/one-hot (no serial scatter).
    onehot = (top_idx[:, :, None] == jnp.arange(NUM_EXPERTS)[None, None, :])
    dense_w = jnp.sum(onehot * combine[:, :, None], axis=1)       # (T, E)
    # Expand per-expert weight to per-hidden-lane (T, E*I) so the kernel can fold
    # it straight into the stacked hidden activations (no in-kernel iota/select).
    dense_w_exp = jnp.repeat(dense_w, INTERMEDIATE, axis=1).astype(jnp.float32)

    out = fused_sparse_mlp(
        x_tok.astype(jnp.bfloat16), dense_w_exp,
        prepared["gu_all"], prepared["dw_all"],
        prepared["s_gu_w"], prepared["s_gu_b"],
        prepared["s_down_w"], prepared["s_down_b"],
        out_dtype=hidden_states.dtype,
    )
    return out.reshape(B, S, H)


# ----------------------------- pure-JAX f32 reference (sanity check) -----------------------------
def reference_forward(hidden_states, params):
    B, S, H = hidden_states.shape
    x = hidden_states.reshape(-1, H).astype(jnp.float32)
    logits = x @ params["router_w_t"]
    scores, top_idx = jax.lax.top_k(logits, TOP_K)
    combine = jax.nn.softmax(scores, axis=-1)
    onehot = (top_idx[:, :, None] == jnp.arange(NUM_EXPERTS)[None, None, :])
    dense_w = jnp.sum(onehot * combine[:, :, None], axis=1)
    moe = jnp.zeros_like(x)
    for e in range(NUM_EXPERTS):
        h = jax.nn.silu(x @ params["gate_w"][e]) * (x @ params["up_w"][e])
        moe = moe + dense_w[:, e:e + 1] * (h @ params["down_w"][e])
    hs = (jax.nn.silu(x @ params["s_gate_w"] + params["s_gate_b"])
          * (x @ params["s_up_w"] + params["s_up_b"]))
    shared = hs @ params["s_down_w"] + params["s_down_b"]
    return (moe + shared).reshape(B, S, H)


# ----------------------------- deterministic parameter init -----------------------------
def init_params(key):
    ks = jax.random.split(key, 10)
    H, I, E = HIDDEN, INTERMEDIATE, NUM_EXPERTS
    Is = I * NUM_SHARED_EXPERT
    n = lambda k, shape: (INIT_RANGE * jax.random.normal(k, shape, jnp.float32))
    return {
        # router: nn.Linear(H, E, bias=False) -> weight (E, H); stored transposed (H, E)
        "router_w_t": n(ks[0], (H, E)),
        # grouped experts (SwiGLU, no bias)
        "gate_w": n(ks[1], (E, H, I)),
        "up_w": n(ks[2], (E, H, I)),
        "down_w": n(ks[3], (E, I, H)),
        # shared expert _MLP (bias=True), intermediate = I * num_shared_expert
        "s_gate_w": n(ks[4], (H, Is)),
        "s_gate_b": n(ks[5], (1, Is)),
        "s_up_w": n(ks[6], (H, Is)),
        "s_up_b": n(ks[7], (1, Is)),
        "s_down_w": n(ks[8], (Is, H)),
        "s_down_b": n(ks[9], (1, H)),
    }


if __name__ == "__main__":
    key = jax.random.PRNGKey(0)
    k_x, k_p = jax.random.split(key)
    params = init_params(k_p)
    prepared = prepare_params(params)
    hidden_states = jax.random.normal(k_x, (BATCH, SEQ, HIDDEN), jnp.float32)

    out = jax.block_until_ready(sparse_mlp_forward(hidden_states, prepared))
    ref = jax.block_until_ready(reference_forward(hidden_states, params))

    assert out.shape == (BATCH, SEQ, HIDDEN)
    # bf16 MXU operands vs f32 reference -> modest tolerance; accumulation stays f32.
    assert jnp.allclose(out, ref, rtol=1e-2, atol=1e-3), "Pallas output mismatch vs reference"

    print("KERNEL_OK")
</pallas_src>

<mosaic_0001>
module attributes {stable_mosaic.version = 11 : i64} {
  func.func @_fused_moe_kernel(%arg0: i32, %arg1: memref<8x32xbf16, #tpu.memory_space<vmem>>, %arg2: memref<32x512xbf16, #tpu.memory_space<vmem>>, %arg3: memref<256x32xbf16, #tpu.memory_space<vmem>>, %arg4: memref<8x256xf32, #tpu.memory_space<vmem>>, %arg5: memref<32x128xbf16, #tpu.memory_space<vmem>>, %arg6: memref<1x128xf32, #tpu.memory_space<vmem>>, %arg7: memref<64x32xbf16, #tpu.memory_space<vmem>>, %arg8: memref<1x32xf32, #tpu.memory_space<vmem>>, %arg9: memref<8x32xf32, #tpu.memory_space<vmem>>) attributes {dimension_semantics = [#tpu.dimension_semantics<parallel>], iteration_bounds = array<i64: 2>, scalar_prefetch = 0 : i64, scratch_operands = 0 : i64, tpu.core_type = #tpu.core_type<tc>, window_params = [{transform_indices = @transform_0, window_bounds = array<i64: 8, 32>}, {pipeline_mode = #tpu.pipeline_mode<synchronous>, transform_indices = @transform_1, window_bounds = array<i64: 32, 512>}, {pipeline_mode = #tpu.pipeline_mode<synchronous>, transform_indices = @transform_2, window_bounds = array<i64: 256, 32>}, {transform_indices = @transform_3, window_bounds = array<i64: 8, 256>}, {pipeline_mode = #tpu.pipeline_mode<synchronous>, transform_indices = @transform_4, window_bounds = array<i64: 32, 128>}, {pipeline_mode = #tpu.pipeline_mode<synchronous>, transform_indices = @transform_5, window_bounds = array<i64: 1, 128>}, {pipeline_mode = #tpu.pipeline_mode<synchronous>, transform_indices = @transform_6, window_bounds = array<i64: 64, 32>}, {pipeline_mode = #tpu.pipeline_mode<synchronous>, transform_indices = @transform_7, window_bounds = array<i64: 1, 32>}, {transform_indices = @transform_8, window_bounds = array<i64: 8, 32>}]} {
    %c0 = arith.constant 0 : index
    %c0_0 = arith.constant 0 : index
    %0 = vector.load %arg1[%c0, %c0_0] : memref<8x32xbf16, #tpu.memory_space<vmem>>, vector<8x32xbf16>
    %c0_1 = arith.constant 0 : index
    %c0_2 = arith.constant 0 : index
    %1 = vector.load %arg5[%c0_1, %c0_2] : memref<32x128xbf16, #tpu.memory_space<vmem>>, vector<32x128xbf16>
    %cst = arith.constant dense<0.000000e+00> : vector<8x128xf32>
    %2 = tpu.matmul %0, %1, %cst {dimension_numbers = #tpu.dot_dimension_numbers<[1], [0], [0], [1], [0, 0, 1, 1], [], []>} : vector<8x32xbf16>, vector<32x128xbf16>, vector<8x128xf32> -> vector<8x128xf32>
    %c0_3 = arith.constant 0 : index
    %c0_4 = arith.constant 0 : index
    %3 = vector.load %arg6[%c0_3, %c0_4] : memref<1x128xf32, #tpu.memory_space<vmem>>, vector<1x128xf32>
    %4 = vector.broadcast %3 : vector<1x128xf32> to vector<8x128xf32>
    %5 = arith.addf %2, %4 : vector<8x128xf32>
    %6 = vector.extract_strided_slice %5 {offsets = [0, 0], sizes = [8, 64], strides = [1, 1]} : vector<8x128xf32> to vector<8x64xf32>
    %7 = arith.negf %6 : vector<8x64xf32>
    %8 = math.exp %7 : vector<8x64xf32>
    %cst_5 = arith.constant 1.000000e+00 : f32
    %9 = vector.broadcast %cst_5 : f32 to vector<8x64xf32>
    %10 = arith.addf %9, %8 : vector<8x64xf32>
    %11 = arith.divf %9, %10 : vector<8x64xf32>
    %12 = arith.mulf %6, %11 : vector<8x64xf32>
    %13 = vector.extract_strided_slice %5 {offsets = [0, 64], sizes = [8, 64], strides = [1, 1]} : vector<8x128xf32> to vector<8x64xf32>
    %14 = arith.mulf %12, %13 : vector<8x64xf32>
    %15 = arith.truncf %14 : vector<8x64xf32> to vector<8x64xbf16>
    %c0_6 = arith.constant 0 : index
    %c0_7 = arith.constant 0 : index
    %16 = vector.load %arg7[%c0_6, %c0_7] : memref<64x32xbf16, #tpu.memory_space<vmem>>, vector<64x32xbf16>
    %cst_8 = arith.constant dense<0.000000e+00> : vector<8x32xf32>
    %17 = tpu.matmul %15, %16, %cst_8 {dimension_numbers = #tpu.dot_dimension_numbers<[1], [0], [0], [1], [0, 0, 1, 1], [], []>} : vector<8x64xbf16>, vector<64x32xbf16>, vector<8x32xf32> -> vector<8x32xf32>
    %c0_9 = arith.constant 0 : index
    %c0_10 = arith.constant 0 : index
    %18 = vector.load %arg8[%c0_9, %c0_10] : memref<1x32xf32, #tpu.memory_space<vmem>>, vector<1x32xf32>
    %19 = vector.broadcast %18 : vector<1x32xf32> to vector<8x32xf32>
    %20 = arith.addf %17, %19 : vector<8x32xf32>
    %c0_11 = arith.constant 0 : index
    %c0_12 = arith.constant 0 : index
    %21 = vector.load %arg2[%c0_11, %c0_12] : memref<32x512xbf16, #tpu.memory_space<vmem>>, vector<32x512xbf16>
    %cst_13 = arith.constant dense<0.000000e+00> : vector<8x512xf32>
    %22 = tpu.matmul %0, %21, %cst_13 {dimension_numbers = #tpu.dot_dimension_numbers<[1], [0], [0], [1], [0, 0, 1, 1], [], []>} : vector<8x32xbf16>, vector<32x512xbf16>, vector<8x512xf32> -> vector<8x512xf32>
    %23 = vector.extract_strided_slice %22 {offsets = [0, 0], sizes = [8, 256], strides = [1, 1]} : vector<8x512xf32> to vector<8x256xf32>
    %24 = arith.negf %23 : vector<8x256xf32>
    %25 = math.exp %24 : vector<8x256xf32>
    %cst_14 = arith.constant 1.000000e+00 : f32
    %26 = vector.broadcast %cst_14 : f32 to vector<8x256xf32>
    %27 = arith.addf %26, %25 : vector<8x256xf32>
    %28 = arith.divf %26, %27 : vector<8x256xf32>
    %29 = arith.mulf %23, %28 : vector<8x256xf32>
    %30 = vector.extract_strided_slice %22 {offsets = [0, 256], sizes = [8, 256], strides = [1, 1]} : vector<8x512xf32> to vector<8x256xf32>
    %31 = arith.mulf %29, %30 : vector<8x256xf32>
    %c0_15 = arith.constant 0 : index
    %c0_16 = arith.constant 0 : index
    %32 = vector.load %arg4[%c0_15, %c0_16] : memref<8x256xf32, #tpu.memory_space<vmem>>, vector<8x256xf32>
    %33 = arith.mulf %31, %32 : vector<8x256xf32>
    %34 = arith.truncf %33 : vector<8x256xf32> to vector<8x256xbf16>
    %c0_17 = arith.constant 0 : index
    %c0_18 = arith.constant 0 : index
    %35 = vector.load %arg3[%c0_17, %c0_18] : memref<256x32xbf16, #tpu.memory_space<vmem>>, vector<256x32xbf16>
    %cst_19 = arith.constant dense<0.000000e+00> : vector<8x32xf32>
    %36 = tpu.matmul %34, %35, %cst_19 {dimension_numbers = #tpu.dot_dimension_numbers<[1], [0], [0], [1], [0, 0, 1, 1], [], []>} : vector<8x256xbf16>, vector<256x32xbf16>, vector<8x32xf32> -> vector<8x32xf32>
    %37 = arith.addf %20, %36 : vector<8x32xf32>
    %c0_20 = arith.constant 0 : index
    %c0_21 = arith.constant 0 : index
    %38 = vector.load %arg9[%c0_20, %c0_21] : memref<8x32xf32, #tpu.memory_space<vmem>>, vector<8x32xf32>
    tpu.vector_store %arg9[%c0_20, %c0_21], %37 {strides = array<i32>} : memref<8x32xf32, #tpu.memory_space<vmem>>, vector<8x32xf32>,
    return
  }
  func.func @transform_0(%arg0: i32) -> (i32, i32) {
    %c0_i32 = arith.constant 0 : i32
    %c0_i32_0 = arith.constant 0 : i32
    return %arg0, %c0_i32 : i32, i32
  }
  func.func @transform_1(%arg0: i32) -> (i32, i32) {
    %c0_i32 = arith.constant 0 : i32
    %c0_i32_0 = arith.constant 0 : i32
    %c0_i32_1 = arith.constant 0 : i32
    return %c0_i32, %c0_i32_0 : i32, i32
  }
  func.func @transform_2(%arg0: i32) -> (i32, i32) {
    %c0_i32 = arith.constant 0 : i32
    %c0_i32_0 = arith.constant 0 : i32
    %c0_i32_1 = arith.constant 0 : i32
    return %c0_i32, %c0_i32_0 : i32, i32
  }
  func.func @transform_3(%arg0: i32) -> (i32, i32) {
    %c0_i32 = arith.constant 0 : i32
    %c0_i32_0 = arith.constant 0 : i32
    return %arg0, %c0_i32 : i32, i32
  }
  func.func @transform_4(%arg0: i32) -> (i32, i32) {
    %c0_i32 = arith.constant 0 : i32
    %c0_i32_0 = arith.constant 0 : i32
    %c0_i32_1 = arith.constant 0 : i32
    return %c0_i32, %c0_i32_0 : i32, i32
  }
  func.func @transform_5(%arg0: i32) -> (i32, i32) {
    %c0_i32 = arith.constant 0 : i32
    %c0_i32_0 = arith.constant 0 : i32
    %c0_i32_1 = arith.constant 0 : i32
    return %c0_i32, %c0_i32_0 : i32, i32
  }
  func.func @transform_6(%arg0: i32) -> (i32, i32) {
    %c0_i32 = arith.constant 0 : i32
    %c0_i32_0 = arith.constant 0 : i32
    %c0_i32_1 = arith.constant 0 : i32
    return %c0_i32, %c0_i32_0 : i32, i32
  }
  func.func @transform_7(%arg0: i32) -> (i32, i32) {
    %c0_i32 = arith.constant 0 : i32
    %c0_i32_0 = arith.constant 0 : i32
    %c0_i32_1 = arith.constant 0 : i32
    return %c0_i32, %c0_i32_0 : i32, i32
  }
  func.func @transform_8(%arg0: i32) -> (i32, i32) {
    %c0_i32 = arith.constant 0 : i32
    %c0_i32_0 = arith.constant 0 : i32
    return %arg0, %c0_i32 : i32, i32
  }
}

</mosaic_0001>

<bundles_post_ra>
// kernel: tpu_custom_call.1
= control target key start
LH: loop header
LB: loop body
LE: loop exit
PB: predicated region body
PF: predicated region fallthrough
CT: control target
= control target key end

     0   :  { %13 = vsyncpa [#allocation3], 0  ;;  %s1399_s0 = inlined_call_operand.vmem [shape: bf16[16,32], index: 0, kind: input, shape index: {}]   ;;  %s1400_s1 = inlined_call_operand.vmem [shape: bf16[32,512], index: 1, kind: input, shape index: {}]   ;;  %s1401_s2 = inlined_call_operand.vmem [shape: bf16[256,32], index: 2, kind: input, shape index: {}]   ;;  %s1402_s3 = inlined_call_operand.vmem [shape: f32[16,256], index: 3, kind: input, shape index: {}]   ;;  %s1403_s4 = inlined_call_operand.vmem [shape: bf16[32,128], index: 4, kind: input, shape index: {}]   ;;  %s1404_s5 = inlined_call_operand.vmem [shape: f32[1,128], index: 5, kind: input, shape index: {}]   ;;  %s1405_s6 = inlined_call_operand.vmem [shape: bf16[64,32], index: 6, kind: input, shape index: {}]   ;;  %s1406_s7 = inlined_call_operand.vmem [shape: f32[1,32], index: 7, kind: input, shape index: {}]   ;;  %s1407_s8 = inlined_call_operand.hbm [shape: f32[16,32], index: 8, kind: output, shape index: {}]  }
   0x1   :  { %15 = vsyncpa [#allocation3 + $0x1], 0  ;;  %s1166_s27 = smov 0   ;;  %s1168_s28 = smov 0  }
   0x2   :  { %s1170_s29 = smov 0   ;;  %s1172_s30 = smov 0  }
   0x3 LB: > { %s1187_s9 = sadd.s32 4294967295, %s1118_s30   ;;  %s830_s10 = sadd.s32 4294967294, %s1118_s30   ;;  %s1118_s30 = sphi %s1172_s30, %s1413_s30   ;;  %s1114_s29 = sphi %s1170_s29, %s1412_s29   ;;  %s1110_s28 = sphi %s1168_s28, %s1411_s28   ;;  %s1106_s27 = sphi %s1166_s27, %s1410_s27  }
   0x4   : > { %s1191_s11 = sadd.s32 1, %s1118_s30   ;;  %s206_s12 = sadd.s32 1, %s1114_s29 }
   0x5   : > { %s203_s13 = ssub.s32 %s1118_s30, %s1191_s11  ;;  %p216_p0 = scmp.ne.s32.totalorder %s1114_s29, %s1110_s28 }
   0x6   : > { %p204_p1 = scmp.eq.s32.totalorder %s203_s13, 0  ;;  %p217_p2 = scmp.eq.s32.totalorder %s1187_s9, 1 }
   0x7   : > { %p222_p3 = scmp.ne.s32.totalorder %s1110_s28, %s1106_s27  ;;  %p223_p4 = scmp.eq.s32.totalorder %s830_s10, 1 }
   0x8   : > { %s1202_s14 = scalar_select %p204_p1, %s1114_s29, %s206_s12  }
   0x9   : > { %p1204_p5 = por %p217_p2, %p216_p0  ;;  %p1208_p6 = por %p223_p4, %p222_p3 }
   0xa   : > { %p833_p7 = scmp.ge.s32.totalorder %s1118_s30, 1  ;;  %p274_p8 = scmp.lt.s32.totalorder %s1118_s30, 3 }
   0xc   : > { %p275_p9 = pnand %p833_p7, %p274_p8 }
   0xd   : > { %p312_p10 = scmp.lt.s32.totalorder (!%p275_p9), %s1187_s9, 1  ;;  %s309_s20 = sand.u32 (!%p275_p9), 1, %s1110_s28  }
   0xe   : > { %278 = sbr.rel (%p275_p9) target bundleno = 562 (0x232), region = 52 }
  0x13   : > { %v973_v0 = vld [vmem:[%s1403_s4 + $0x8] sm:$0xff]  ;;  %v972_v1 = vld [vmem:[%s1403_s4] sm:$0xff]  ;;  %s1222_s21 = scalar_select %p312_p10, %s1187_s9, 1  ;;  %vm343_vm0 = vcmask 261120   ;;  %v885_v4 = vld [vmem:[%s1400_s1 + $0x30] sm:$0xf0] }
  0x14   : > { %353 = vmatpush.bf16.msra.mxu0 %v973_v0  ;;  %v982_v3 = vld [vmem:[%s1400_s1 + $0x24] sm:$0xf]  ;;  %v883_v5 = vld [vmem:[%s1400_s1 + $0x20] sm:$0xf]  ;;  %v984_v7 = vld [vmem:[%s1400_s1 + $0x2c] sm:$0xf0] }
  0x15   : > { %s835_s22 = sshll.u32 %s1222_s21, 2  ;;  %v888_v6 = vor.u32 %v982_v3, %v885_v4  ;;  %v978_v8 = vld [vmem:[%s1400_s1 + $0x4] sm:$0xf]  ;;  %v869_v9 = vld [vmem:[%s1400_s1 + $0x10] sm:$0xf0]  ;;  %v884_v10 = vor.u32 %v984_v7, %v883_v5  ;;  %v977_v17 = vld [vmem:[%s1405_s6 + $0x18] sm:$0xff] }
  0x16   : > { %s315_s25 = scalar_lea.vmem %s1399_s0, %s835_s22  ;;  %v867_v11 = vld [vmem:[%s1400_s1] sm:$0xf]  ;;  %v980_v12 = vld [vmem:[%s1400_s1 + $0xc] sm:$0xf0]  ;;  %v983_v13 = vld [vmem:[%s1400_s1 + $0x2c] sm:$0xf]  ;;  %v872_v14 = vor.u32 %v978_v8, %v869_v9 }
  0x17   : > { %v1228_v2 = vld [vmem:[%s315_s25] sm:$0xf]  ;;  %506 = vmatpush.bf16.msra.mxu3 %v888_v6  ;;  %v893_v15 = vld [vmem:[%s1400_s1 + $0x38] sm:$0xf0]  ;;  %493 = vmatpush.bf16.msra.mxu2 %v884_v10  ;;  %v868_v16 = vor.u32 %v980_v12, %v867_v11  ;;  %v979_v19 = vld [vmem:[%s1400_s1 + $0xc] sm:$0xf] }
  0x18   : > { %354 = vmatpush.bf16.msra.mxu0 %v972_v1  ;;  %v896_v18 = vor.u32 %v983_v13, %v893_v15  ;;  %v877_v20 = vld [vmem:[%s1400_s1 + $0x18] sm:$0xf0]  ;;  %v976_v21 = vld [vmem:[%s1405_s6 + $0x10] sm:$0xff]  ;;  %v975_v23 = vld [vmem:[%s1405_s6 + $0x8] sm:$0xff]  ;;  %s1120_s22 = smov 64   ;;  %vm422_vm5 = vcmask 523264  }
  0x19   : > { %v880_v22 = vor.u32 %v979_v19, %v877_v20  ;;  %v1042_v24 = vld [vmem:[%s1404_s5] ss:$0 sm:$0xff]  ;;  %v891_v32 = vld [vmem:[%s1400_s1 + $0x28] sm:$0xf]  ;;  %v985_v33 = vld [vmem:[%s1400_s1 + $0x34] sm:$0xf0] }
  0x1a   : > { %v974_v31 = vld [vmem:[%s1405_s6] sm:$0xff]  ;;  %v875_v34 = vld [vmem:[%s1400_s1 + $0x8] sm:$0xf]  ;;  %v892_v36 = vor.u32 %v985_v33, %v891_v32  ;;  %v981_v37 = vld [vmem:[%s1400_s1 + $0x14] sm:$0xf0]  ;;  %s971_s13 = sshll.u32 %s1222_s21, 4 }
  0x1b   : > { %846 = vmatmul.msk.bf16.vlgmr.msra.gmra.mxu0 %vm343_vm0, %v1228_v2  ;;  %507 = vmatpush.bf16.msra.mxu3 %v872_v14  ;;  %v876_v38 = vor.u32 %v981_v37, %v875_v34  ;;  %v1001_v52 = vld [vmem:[%s1401_s2 + $0x78] sm:$0xff]  ;;  %v1000_v54 = vld [vmem:[%s1401_s2 + $0x70] sm:$0xff]  ;;  %v999_v58 = vld [vmem:[%s1401_s2 + $0x68] sm:$0xff]  ;;  %s1339_s19 = scalar_lea.vmem %s1402_s3, %s971_s13  ;;  %s834_s21 = sshll.u32 %s309_s20, 3 }
  0x1c   : > { %430 = vmatpush.bf16.msrb.mxu0 %v977_v17  ;;  %494 = vmatpush.bf16.msra.mxu2 %v868_v16  ;;  %v993_v55 = vld [vmem:[%s1401_s2 + $0x38] sm:$0xff]  ;;  %v992_v59 = vld [vmem:[%s1401_s2 + $0x30] sm:$0xff]  ;;  %v998_v60 = vld [vmem:[%s1401_s2 + $0x60] sm:$0xff] }
  0x1d   : > { %728 = vmatpush.bf16.msra.mxu1 %v1001_v52  ;;  %v997_v1 = vld [vmem:[%s1401_s2 + $0x58] sm:$0xff]  ;;  %v996_v3 = vld [vmem:[%s1401_s2 + $0x50] sm:$0xff]  ;;  %v995_v8 = vld [vmem:[%s1401_s2 + $0x48] sm:$0xff] }
  0x1e   : > { %898 = vmatmul.msk.bf16.vlgmr.msra.gmra.mxu3 %vm343_vm0, %v1228_v2  ;;  %v994_v12 = vld [vmem:[%s1401_s2 + $0x40] sm:$0xff] }
  0x1f   : > { %897 = vmatmul.msk.bf16.vlgmr.msra.gmra.mxu2 %vm343_vm0, %v1228_v2  ;;  %715 = vmatpush.bf16.msrb.mxu3 %v993_v55  ;;  %v1043_v52 = vld [vmem:[%s1406_s7] ss:$0 sm:$0xff] }
  0x20   : > { %532 = vmatpush.bf16.msrb.mxu2 %v896_v18  ;;  %431 = vmatpush.bf16.msrb.mxu0 %v976_v21  ;;  %v582_v18 = vld [vmem:[%s1339_s19 + $0x8] sm:$0xff] }
  0x21   : > { %729 = vmatpush.bf16.msra.mxu1 %v1000_v54 }
  0x23   : > { %716 = vmatpush.bf16.msrb.mxu3 %v992_v59 }
  0x24   : > { %533 = vmatpush.bf16.msrb.mxu2 %v880_v22  ;;  %432 = vmatpush.bf16.msrb.mxu0 %v975_v23  ;;  %v991_v22 = vld [vmem:[%s1401_s2 + $0x28] sm:$0xff] }
  0x25   : > { %730 = vmatpush.bf16.msra.mxu1 %v999_v58 }
  0x27   : > { %717 = vmatpush.bf16.msrb.mxu3 %v991_v22 }
  0x28   : > { %433 = vmatpush.bf16.msrb.mxu0 %v974_v31 }
  0x29   : > { %731 = vmatpush.bf16.msra.mxu1 %v998_v60 }
  0x2c   : > { %519 = vmatpush.bf16.msra.mxu0 %v892_v36 }
  0x2d   : > { %732 = vmatpush.bf16.msra.mxu1 %v997_v1 }
  0x2f   : > { %900 = vmatmul.msk.bf16.vlgmr.msrb.gmra.mxu2 %vm343_vm0, %v1228_v2 }
  0x30   : > { %520 = vmatpush.bf16.msra.mxu0 %v876_v38 }
  0x31   : > { %733 = vmatpush.bf16.msra.mxu1 %v996_v3 }
  0x35   : > { %734 = vmatpush.bf16.msra.mxu1 %v995_v8 }
  0x39   : > { %735 = vmatpush.bf16.msra.mxu1 %v994_v12 }
  0x98   : > { %v356_v25 = vpop.f32.mrf.mxu0 }
  0x99   : > { %v357_v26 = vadd.f32 %v1042_v24, %v356_v25  ;;  %v990_v24 = vld [vmem:[%s1401_s2 + $0x20] sm:$0xff]  ;;  %v989_v25 = vld [vmem:[%s1401_s2 + $0x18] sm:$0xff] }
  0x9a   : > { %718 = vmatpush.bf16.msrb.mxu3 %v990_v24 }
  0x9b   : > { %381 = vrot.lane.b32.xlu0 %v357_v26, %s1120_s22  ;;  %v847_v28 = vmul.f32 -1.442695, %v357_v26  ;;  %s968_s22 = sshll.u32 %s1187_s9, 3  ;;  %s744_s9 = scalar_lea.sflag [#allocation3], %s309_s20 }
  0x9c   : > { %s754_s10 = scalar_lea.hbm %s1407_s8, %s968_s22 }
  0x9d   : > { %1044 = vpow2.f32 %v847_v28  ;;  %s758_s13 = sshll.u32 %s754_s10, 4  ;;  %s759_s13 = int_to_ptr.hbm [resolvable:$true] %s758_s13 }
  0x9e   : > { %719 = vmatpush.bf16.msrb.mxu3 %v989_v25  ;;  %s1070_s17 = sshra.s32 %s759_s13, 4  ;;  %s1071_s17 = int_to_ptr.hbm [resolvable:$true] %s1070_s17 }
  0x9f   : > { %s1072_s18 = scalar_lea.hbm %s1071_s17, 8  ;;  %p1077_p0 = scmp.lt.s32.totalorder %s1071_s17, %s1407_s8 }
  0xa0   : > { %v358_v27 = vpop.f32.mrf.mxu0  ;;  %p1073_p11 = scmp.ne.s32.totalorder %s1071_s17, %s1072_s18 }
  0xa1   : > { %v509_v53 = vpop.f32.mrf.mxu3 }
  0xa2   : > { %v902_v56 = vmul.f32 -1.442695, %v509_v53  ;;  %v1310_v57 = vpop.f32.mrf.mxu2  ;;  %p1074_p12 = pnand %p1073_p11, %p1204_p5 }
  0xa3   : > { %v1045_v29 = vpop.eup %1044  ;;  %v901_v23 = vmul.f32 -1.442695, %v1310_v57 }
  0xa4   : > { %v363_v30 = vadd.f32 1.0, %v1045_v29  ;;  %v987_v29 = vld [vmem:[%s1401_s2 + $0x8] sm:$0xff]  ;;  %p1075_p13 = pneg %p1074_p12 }
  0xa6   : > { %1046 = vrcp.f32 %v363_v30  ;;  %v375_v43 = vand.u32 2147483648, %v363_v30  ;;  %vm369_vm2 = vweird.f32 %v363_v30  ;;  %v373_v44 = vand.u32 2147483647, %v363_v30 }
  0xa7   : > { %1048 = vpow2.f32 %v902_v56 }
  0xa8   : > { %v376_v46 = vor.u32 1.1754944e-38, %v375_v43  ;;  %vm374_vm4 = vcmp.eq.f32.partialorder %v373_v44, 8.507059e+37 }
  0xa9   : > { %v511_v61 = vpop.f32.mrf.mxu3 }
  0xaa   : > { %v498_v63 = vpop.f32.mrf.mxu2 }
  0xac   : > { %v1047_v35 = vpop.eup %1046 }
  0xad   : > { %v365_v39 = vmul.f32 %v1047_v35, %v363_v30  ;;  %vm370_vm1 = vweird.f32 %v1047_v35  ;;  %v1049_v62 = vpop.eup %1048  ;;  %v986_v30 = vld [vmem:[%s1401_s2] sm:$0xff] }
  0xae   : > { %vm371_vm3 = vmor %vm369_vm2, %vm370_vm1  ;;  %v546_v0 = vadd.f32 1.0, %v1049_v62 }
  0xaf   : > { %v366_v40 = vsub.f32 1.0, %v365_v39 }
  0xb0   : > { %1050 = vrcp.f32 %v546_v0  ;;  %v573_v7 = vand.u32 2147483648, %v546_v0  ;;  %vm567_vm6 = vweird.f32 %v546_v0  ;;  %v571_v10 = vand.u32 2147483647, %v546_v0 }
  0xb1   : > { %v367_v41 = vmul.f32 %v1047_v35, %v366_v40  ;;  %1052 = vpow2.f32 %v901_v23 }
  0xb2   : > { %v535_v4 = vpop.f32.mrf.mxu2  ;;  %v574_v11 = vor.u32 1.1754944e-38, %v573_v7  ;;  %vm572_vm9 = vcmp.eq.f32.partialorder %v571_v10, 8.507059e+37 }
  0xb3   : > { %v368_v42 = vadd.f32 %v1047_v35, %v367_v41 }
  0xb5   : > { %v372_v45 = vsel %vm371_vm3, %v1047_v35, %v368_v42 }
  0xb6   : > { %v377_v47 = vsel %vm374_vm4, %v376_v46, %v372_v45  ;;  %v1051_v5 = vpop.eup %1050  ;;  %v581_v45 = vld [vmem:[%s1339_s19] sm:$0xff]  ;;  %s311_s19 = scalar_lea.vmem [#allocation2], %s834_s21  ;;  %s1076_s21 = scalar_lea.hbm %s1407_s8, 16 }
  0xb7   : > { %v379_v48 = vmul.f32 %v377_v47, %v357_v26  ;;  %v563_v6 = vmul.f32 %v1051_v5, %v546_v0  ;;  %vm568_vm7 = vweird.f32 %v1051_v5  ;;  %v988_v26 = vld [vmem:[%s1401_s2 + $0x10] sm:$0xff]  ;;  %v1053_v27 = vpop.eup %1052  ;;  %s756_s12 = sshll.u32 %s311_s19, 4  ;;  %p1078_p1 = scmp.lt.s32.totalorder %s1076_s21, %s1072_s18  ;;  %s757_s12 = int_to_ptr.vmem [resolvable:$true] %s756_s12 }
  0xb8   : > { %vm569_vm8 = vmor %vm567_vm6, %vm568_vm7  ;;  %v545_v28 = vadd.f32 1.0, %v1053_v27  ;;  %720 = vmatpush.bf16.msrb.mxu3 %v988_v26 }
  0xb9   : > { %v564_v9 = vsub.f32 1.0, %v563_v6  ;;  %p1079_p2 = por %p1078_p1, %p1077_p0 }
  0xba   : > { %v537_v14 = vpop.f32.mrf.mxu2  ;;  %1054 = vrcp.f32 %v545_v28  ;;  %vm552_vm10 = vweird.f32 %v545_v28  ;;  %v558_v36 = vand.u32 2147483648, %v545_v28  ;;  %v556_v38 = vand.u32 2147483647, %v545_v28 }
  0xbb   : > { %p1080_p3 = pnand %p1079_p2, %p1075_p13 }
  0xbc   : > { %721 = vmatpush.bf16.msrb.mxu3 %v987_v29  ;;  %v559_v39 = vor.u32 1.1754944e-38, %v558_v36  ;;  %vm557_vm13 = vcmp.eq.f32.partialorder %v556_v38, 8.507059e+37 }
  0xc0   : > { %722 = vmatpush.bf16.msrb.mxu3 %v986_v30  ;;  %v1055_v31 = vpop.eup %1054 }
  0xc1   : > { %v548_v32 = vmul.f32 %v1055_v31, %v545_v28  ;;  %vm553_vm11 = vweird.f32 %v1055_v31 }
  0xc2   : > { %vm554_vm12 = vmor %vm552_vm10, %vm553_vm11 }
  0xc3   : > { %v549_v33 = vsub.f32 1.0, %v548_v32 }
  0xc5   : > { %v550_v35 = vmul.f32 %v1055_v31, %v549_v33 }
  0xc7   : > { %v551_v37 = vadd.f32 %v1055_v31, %v550_v35 }
  0xc9   : > { %v555_v41 = vsel %vm554_vm12, %v1055_v31, %v551_v37 }
  0xca   : > { %v560_v42 = vsel %vm557_vm13, %v559_v39, %v555_v41 }
  0xcb   : > { %v577_v43 = vmul.f32 %v560_v42, %v1310_v57 }
 0x10d   : > { %v382_v49 = vpop.permute.xlu0 %381 }
 0x10e   : > { %v384_v50 = vmul.f32 %v382_v49, %v379_v48 }
 0x110   : > { %v385_v51 = vpack.c.bf16 %v384_v50, %v384_v50 }
 0x112   : > { %864 = vmatmul.msk.bf16.vlgmr.msrb.gmra.mxu0 %vm422_vm5, %v385_v51 }
 0x122   : > { %899 = vmatmul.msk.bf16.vlgmr.msra.gmra.mxu0 %vm343_vm0, %v1228_v2  ;;  %v565_v2 = vmul.f32 %v1051_v5, %v564_v9 }
 0x124   : > { %v566_v13 = vadd.f32 %v1051_v5, %v565_v2 }
 0x126   : > { %v570_v15 = vsel %vm569_vm8, %v1051_v5, %v566_v13 }
 0x127   : > { %v575_v16 = vsel %vm572_vm9, %v574_v11, %v570_v15 }
 0x128   : > { %v578_v17 = vmul.f32 %v575_v16, %v509_v53 }
 0x12a   : > { %v580_v19 = vmul.f32 %v578_v17, %v535_v4 }
 0x12c   : > { %v584_v20 = vmul.f32 %v582_v18, %v580_v19 }
 0x12e   : > { %v586_v21 = vpack.c.bf16 %v584_v20, %v584_v20 }
 0x130   : > { %736 = vmatmul.bf16.vlgmr.msra.gmra.mxu1 %v586_v21 }
 0x18f   : > { %v435_v34 = vpop.f32.mrf.mxu0 }
 0x190   : > { %v436_v54 = vadd.f32 %v1043_v52, %v435_v34 }
 0x197   : > { %v437_v40 = vpop.f32.mrf.mxu0 }
 0x19f   : > { %v522_v44 = vpop.f32.mrf.mxu0 }
 0x1a0   : > { %v579_v46 = vmul.f32 %v577_v43, %v522_v44 }
 0x1a2   : > { %v583_v47 = vmul.f32 %v581_v45, %v579_v46 }
 0x1a4   : > { %v585_v48 = vpack.c.bf16 %v583_v47, %v583_v47 }
 0x1a6   : > { %723 = vmatmul.bf16.vlgmr.msrb.gmra.mxu3 %v585_v48 }
 0x1a7   : > { %v524_v49 = vpop.f32.mrf.mxu0 }
 0x1ad   : > { %v737_v50 = vpop.f32.mrf.mxu1 }
 0x1b5   : > { %v739_v51 = vpop.f32.mrf.mxu1 }
 0x229   : > { %v724_v53 = vpop.f32.mrf.mxu3 }
 0x22a   : > { %v738_v55 = vadd.f32 %v737_v50, %v724_v53 }
 0x22c   : > { %v741_v56 = vadd.f32 %v738_v55, %v436_v54 }
 0x22e   : > { %742 = vst.msk [vmem:[%s311_s19] sm:$0xff] %vm343_vm0, %v741_v56 }
 0x22f   : > { %1083 = shalt.err (!%p1080_p3)
}
 0x230   : > { %1002 = dma.vmem_to_hbm [thread:$0]  (%p1204_p5), %s757_s12, 128, %s759_s13, %s744_s9  }
 0x231   : > { %v726_v57 = vpop.f32.mrf.mxu3 }
 0x232 PF: > { %p1008_p4 = scmp.ge.s32.totalorder %s1118_s30, 2  ;;  %s770_s20 = sand.u32 1, %s1106_s27  }
 0x233   : > { %s771_s26 = scalar_lea.sflag [#allocation3], %s770_s20 }
 0x234   : > { %p1005_p7 = pnand %p1008_p4, %p1208_p6 }
 0x236   : > { %p1006_p8 = pneg %p1005_p7 }
 0x238   : > { %1101 = dma.done.wait (%p1006_p8), %s771_s26, 128  }
 0x239   : > { %1103 = vsyncadd (%p1006_p8), %s771_s26, 4294967168  ;;  %p18_p9 = scmp.ge.s32.totalorder %s1191_s11, 4   ;;  %s1410_s27 = smov %s1110_s28 }
 0x23a   : > { %s1411_s28 = smov %s1114_s29  ;;  %s1412_s29 = smov %s1202_s14 }
 0x23b   : > { %s1413_s30 = smov %s1191_s11  ;;  %20 = sbr.rel (!%p18_p9) target bundleno = 3 (0x3), region = 90 }
 0x240   :  { %777 = vsyncpa [#allocation3], 1 }
 0x241   :  { %779 = vsyncpa [#allocation3 + $0x1], 1 }

</bundles_post_ra>
